<compile_context>
chip_gen: v7x
topology: tpu7x:2x2x1
jax: 0.10.0
libtpu: 0.0.40
codegen_flags: <defaults>
</compile_context>

<pallas_src>
import jax
import jax.numpy as jnp
from jax.experimental import pallas as pl
from jax.experimental.pallas import tpu as pltpu


# ----- parameter construction (matches torch __init__, plain JAX glue) -----
def inv_softplus(y):
    _y = y - 1e-06
    return _y + jnp.log(-jnp.expm1(-_y))


def softplus(x):
    # F.softplus(x, beta=1.0, threshold=20.0) + 1e-06
    return jnp.where(x > 20.0, x, jnp.log1p(jnp.exp(x))) + 1e-06


# ----- Pallas kernel: elementwise doubly-bounded scaling -----
def dbs_kernel(ab_ref, x_ref, o_ref):
    # ab_ref lives in SMEM: [a, b] scalars
    a = ab_ref[0]
    b = ab_ref[1]

    # Cast in-kernel: input is DMA'd in its original dtype.
    x = x_ref[...].astype(jnp.float32)

    # log(sigmoid(x)) computed stably with one exp + one log:
    #   log_sigmoid(x) = min(x, 0) - log1p(exp(-|x|))
    log_p = jnp.minimum(x, 0.0) - jnp.log1p(jnp.exp(-jnp.abs(x)))

    u = jnp.exp(a * log_p)               # p ** a
    w = jnp.exp(b * jnp.log1p(-u))       # (1 - p**a) ** b

    one_minus_q = w * (1.0 - 2e-06) - 1e-06
    q = 1.0 - one_minus_q                # == 1 - w*(1-2e-6) + 1e-6

    # torch.logit(q) = log(q) - log(1 - q)
    o_ref[...] = (jnp.log(q) - jnp.log(one_minus_q)).astype(o_ref.dtype)


# ----- tiling plan: big lane-dense blocks, multi-step parallel grid -----
def _plan_tiling(total, itemsize):
    # Wide last dim for large inputs -> fewer grid steps, wide unmasked vst;
    # 128 lanes keeps padding negligible for tiny inputs.
    lanes = 1024 if total >= 64 * 1024 else 128
    # Row granularity keeps blocks aligned to native tiles for any dtype:
    # (8,128) f32 / (16,128) bf16 / (32,128) int8-class.
    row_gran = max(8, 32 // max(1, itemsize))
    rows = -(-total // lanes)                                   # ceil div
    # Cap per block at ~256K elements (~1 MiB f32): in+out double-buffered
    # stays ~4 MiB of VMEM -> fits v5e/v6e/v7x alike.
    max_block_rows = max(row_gran, (256 * 1024 // lanes) // row_gran * row_gran)
    # Aim for at least 2 grid steps (v7x megacore) when there is enough data.
    half_rows = -(-rows // 2)
    block_rows = -(-half_rows // row_gran) * row_gran
    block_rows = max(row_gran, min(max_block_rows, block_rows))
    rows_padded = -(-rows // block_rows) * block_rows
    return lanes, block_rows, rows_padded


def doubly_bounded_scaling(x, a, b):
    orig_shape = x.shape
    orig_dtype = x.dtype
    total = x.size

    lanes, block_rows, rows_padded = _plan_tiling(
        total, jnp.dtype(orig_dtype).itemsize)
    padded_total = rows_padded * lanes

    xf = x.reshape(-1)
    if padded_total != total:
        xf = jnp.pad(xf, (0, padded_total - total))
    x2 = xf.reshape(rows_padded, lanes)        # original dtype; kernel casts

    ab = jnp.array([a, b], dtype=jnp.float32)
    grid = (rows_padded // block_rows,)

    out = pl.pallas_call(
        dbs_kernel,
        out_shape=jax.ShapeDtypeStruct((rows_padded, lanes), orig_dtype),
        grid_spec=pltpu.PrefetchScalarGridSpec(
            num_scalar_prefetch=0,
            grid=grid,
            in_specs=[
                pl.BlockSpec(memory_space=pltpu.MemorySpace.SMEM),  # [a, b]
                pl.BlockSpec((block_rows, lanes), lambda i: (i, 0)),
            ],
            out_specs=pl.BlockSpec((block_rows, lanes), lambda i: (i, 0)),
        ),
        compiler_params=pltpu.CompilerParams(
            dimension_semantics=("parallel",),
        ),
    )(ab, x2)

    if padded_total != total:
        out = out.reshape(-1)[:total]
    return out.reshape(orig_shape)


# ----- pure-JAX reference (literal translation of the torch forward) -----
def reference(x, a, b):
    p = jax.nn.sigmoid(x.astype(jnp.float32))
    q = 1.0 - (1.0 - p ** a) ** b * (1.0 - 2e-06) + 1e-06
    return jnp.log(q / (1.0 - q)).astype(x.dtype)


if __name__ == "__main__":
    # Deterministic parameter init, exactly as the module's __init__:
    _a = inv_softplus(jnp.float32(1.0))
    _b = inv_softplus(jnp.float32(1.0))
    a = softplus(_a)
    b = softplus(_b)

    key = jax.random.PRNGKey(0)
    x = jax.random.normal(key, (2, 4, 16, 16), dtype=jnp.float32)  # NCHW logits

    out = doubly_bounded_scaling(x, a, b)
    out = jax.block_until_ready(out)
    ref = reference(x, a, b)
    assert out.shape == x.shape
    assert jnp.allclose(out, ref, atol=1e-4, rtol=1e-4)

    # Also exercise the ragged/padding path (shape not divisible by 128).
    x2 = jax.random.normal(jax.random.PRNGKey(1), (3, 5, 7), dtype=jnp.float32)
    out2 = jax.block_until_ready(doubly_bounded_scaling(x2, a, b))
    assert out2.shape == x2.shape
    assert jnp.allclose(out2, reference(x2, a, b), atol=1e-4, rtol=1e-4)

    print("KERNEL_OK")
</pallas_src>

<mosaic_0001>
module attributes {stable_mosaic.version = 11 : i64} {
  func.func @dbs_kernel(%arg0: i32, %arg1: memref<2xf32, #tpu.memory_space<smem>>, %arg2: memref<8x128xf32, #tpu.memory_space<vmem>>, %arg3: memref<8x128xf32, #tpu.memory_space<vmem>>) attributes {dimension_semantics = [#tpu.dimension_semantics<parallel>], iteration_bounds = array<i64: 2>, scalar_prefetch = 0 : i64, scratch_operands = 0 : i64, tpu.core_type = #tpu.core_type<tc>, window_params = [{transform_indices = @transform_0, window_bounds = array<i64: 2>}, {transform_indices = @transform_1, window_bounds = array<i64: 8, 128>}, {transform_indices = @transform_2, window_bounds = array<i64: 8, 128>}]} {
    %c0 = arith.constant 0 : index
    %0 = memref.load %arg1[%c0] : memref<2xf32, #tpu.memory_space<smem>>
    %c1 = arith.constant 1 : index
    %1 = memref.load %arg1[%c1] : memref<2xf32, #tpu.memory_space<smem>>
    %c0_0 = arith.constant 0 : index
    %c0_1 = arith.constant 0 : index
    %2 = vector.load %arg2[%c0_0, %c0_1] : memref<8x128xf32, #tpu.memory_space<vmem>>, vector<8x128xf32>
    %cst = arith.constant 0.000000e+00 : f32
    %3 = vector.broadcast %cst : f32 to vector<8x128xf32>
    %4 = arith.minimumf %2, %3 : vector<8x128xf32>
    %5 = math.absf %2 : vector<8x128xf32>
    %cst_2 = arith.constant 0.000000e+00 : f32
    %6 = vector.broadcast %cst_2 : f32 to vector<8x128xf32>
    %7 = arith.subf %6, %5 : vector<8x128xf32>
    %8 = math.exp %7 : vector<8x128xf32>
    %9 = math.log1p %8 : vector<8x128xf32>
    %10 = arith.subf %4, %9 : vector<8x128xf32>
    %11 = vector.broadcast %0 : f32 to vector<8x128xf32>
    %12 = arith.mulf %11, %10 : vector<8x128xf32>
    %13 = math.exp %12 : vector<8x128xf32>
    %cst_3 = arith.constant 0.000000e+00 : f32
    %14 = vector.broadcast %cst_3 : f32 to vector<8x128xf32>
    %15 = arith.subf %14, %13 : vector<8x128xf32>
    %16 = math.log1p %15 : vector<8x128xf32>
    %17 = vector.broadcast %1 : f32 to vector<8x128xf32>
    %18 = arith.mulf %17, %16 : vector<8x128xf32>
    %19 = math.exp %18 : vector<8x128xf32>
    %cst_4 = arith.constant 0.999997973 : f32
    %20 = vector.broadcast %cst_4 : f32 to vector<8x128xf32>
    %21 = arith.mulf %19, %20 : vector<8x128xf32>
    %cst_5 = arith.constant 9.99999997E-7 : f32
    %22 = vector.broadcast %cst_5 : f32 to vector<8x128xf32>
    %23 = arith.subf %21, %22 : vector<8x128xf32>
    %cst_6 = arith.constant 1.000000e+00 : f32
    %24 = vector.broadcast %cst_6 : f32 to vector<8x128xf32>
    %25 = arith.subf %24, %23 : vector<8x128xf32>
    %26 = math.log %25 : vector<8x128xf32>
    %27 = math.log %23 : vector<8x128xf32>
    %28 = arith.subf %26, %27 : vector<8x128xf32>
    %c0_7 = arith.constant 0 : index
    %c0_8 = arith.constant 0 : index
    %29 = vector.load %arg3[%c0_7, %c0_8] : memref<8x128xf32, #tpu.memory_space<vmem>>, vector<8x128xf32>
    tpu.vector_store %arg3[%c0_7, %c0_8], %28 {strides = array<i32>} : memref<8x128xf32, #tpu.memory_space<vmem>>, vector<8x128xf32>,
    return
  }
  func.func @transform_0(%arg0: i32) -> i32 {
    %c0_i32 = arith.constant 0 : i32
    %c0_i32_0 = arith.constant 0 : i32
    return %c0_i32 : i32
  }
  func.func @transform_1(%arg0: i32) -> (i32, i32) {
    %c0_i32 = arith.constant 0 : i32
    %c0_i32_0 = arith.constant 0 : i32
    return %arg0, %c0_i32 : i32, i32
  }
  func.func @transform_2(%arg0: i32) -> (i32, i32) {
    %c0_i32 = arith.constant 0 : i32
    %c0_i32_0 = arith.constant 0 : i32
    return %arg0, %c0_i32 : i32, i32
  }
}

</mosaic_0001>

<bundles_post_ra>
// kernel: tpu_custom_call.1
= control target key start
LH: loop header
LB: loop body
LE: loop exit
PB: predicated region body
PF: predicated region fallthrough
CT: control target
= control target key end

     0   :  { %7 = vsyncpa [#allocation5], 0  ;;  %s741_s0 = inlined_call_operand.hbm [shape: f32[2], index: 0, kind: input, shape index: {}]   ;;  %s742_s1 = inlined_call_operand.hbm [shape: f32[16,128], index: 1, kind: input, shape index: {}]   ;;  %s743_s2 = inlined_call_operand.hbm [shape: f32[16,128], index: 2, kind: output, shape index: {}]  }
   0x1   :  { %8 = vsyncpa [#allocation3], 0 }
   0x2   :  { %10 = vsyncpa [#allocation3 + $0x1], 0 }
   0x3   :  { %11 = vsyncpa [#allocation4], 0 }
   0x4   :  { %13 = vsyncpa [#allocation4 + $0x1], 0  ;;  %s532_s9 = smov 0   ;;  %s534_s10 = smov 0  }
   0x5   :  { %s536_s11 = smov 0   ;;  %s538_s12 = smov 0  }
   0x6 LB: > { %s553_s13 = sadd.s32 4294967295, %s512_s12   ;;  %s312_s14 = sadd.s32 4294967294, %s512_s12   ;;  %s512_s12 = sphi %s538_s12, %s764_s12   ;;  %s508_s11 = sphi %s536_s11, %s763_s11   ;;  %s504_s10 = sphi %s534_s10, %s762_s10   ;;  %s500_s9 = sphi %s532_s9, %s761_s9  }
   0x7   : > { %p60_p0 = scmp.ne.s32.totalorder %s504_s10, %s500_s9  ;;  %p744_p1 = scmp.eq.s32.totalorder %s553_s13, 0 }
   0x8   : > { %p90_p3 = scmp.eq.s32.totalorder %s312_s14, 1  ;;  %p313_p5 = scmp.ge.s32.totalorder %s512_s12, 1 }
   0x9   : > { %p562_p4 = por %p744_p1, %p60_p0  ;;  %p97_p7 = scmp.lt.s32.totalorder %s512_s12, 3 }
   0xa   : > { %p567_p6 = por %p90_p3, %p60_p0  ;;  %s578_s18 = sadd.s32 1, %s512_s12  }
   0xb   : > { %s747_s15 = scalar_select %p562_p4, 1, 0 }
   0xc   : > { %s748_s16 = scalar_select %p567_p6, 1, 0 }
   0xd   : > { %p572_p8 = pnand %p313_p5, %p97_p7  ;;  %s44_s19 = ssub.s32 %s512_s12, %s578_s18 }
   0xe   : > { %s47_s20 = sadd.s32 1, %s508_s11  ;;  %p591_p12 = scmp.eq.s32.totalorder %s44_s19, 0 }
   0xf   : > { %p336_p10 = pneg %p572_p8  ;;  %p54_p13 = scmp.ne.s32.totalorder %s508_s11, %s504_s10 }
  0x10   : > { %p55_p0 = scmp.eq.s32.totalorder %s512_s12, 0  ;;  %p349_p3 = scmp.lt.s32.totalorder %s512_s12, 2 }
  0x11   : > { %p587_p11 = pnand %p336_p10, %p744_p1  ;;  %s399_s25 = scalar_lea.hbm %s741_s0, 16 }
  0x12   : > { %p400_p5 = scmp.ne.s32.totalorder %s741_s0, %s399_s25  ;;  %p406_p1 = scmp.lt.u32.totalorder %s399_s25, %s741_s0 }
  0x13   : > { %p401_p7 = pneg %p587_p11 }
  0x15   : > { %p402_p10 = pnand %p401_p7, %p400_p5 }
  0x17   : > { %p403_p9 = pneg %p402_p10 }
  0x19   : > { %p408_p2 = pnand %p406_p1, %p403_p9 }
  0x1b   : > { %411 = shalt.err (!%p408_p2)
}
  0x1c   : > { %s514_s30 = smov [#allocation2]   ;;  %p56_p1 = por %p55_p0, %p54_p13 }
  0x1d   : > { %339 = dma.hbm_to_smem (!%p587_p11), %s741_s0, 16, %s514_s30, [#allocation5]  }
  0x1e   : > { %s618_s5 = scalar_select %p591_p12, %s508_s11, %s47_s20  }
  0x1f   : > { %p752_p2 = scmp.eq.s32.totalorder %s553_s13, 1  ;;  %s119_s7 = sand.u32 1, %s508_s11  }
  0x20   : > { %s317_s8 = sshll.u32 %s512_s12, 7  ;;  %s316_s14 = sshll.u32 %s119_s7, 3 }
  0x21   : > { %p630_p9 = por %p752_p2, %p54_p13  ;;  %s639_s23 = scalar_lea.hbm %s742_s1, %s317_s8 }
  0x22   : > { %s123_s20 = scalar_lea.vmem [#allocation6], %s316_s14  ;;  %p643_p11 = pnand %p349_p3, %p56_p1 }
  0x23   : > { %s753_s6 = scalar_select %p630_p9, 1, 0 }
  0x24   : > { %s130_s22 = sshll.u32 %s123_s20, 4  ;;  %s120_s25 = scalar_lea.sflag [#allocation3], %s119_s7  ;;  %s647_s22 = int_to_ptr.vmem [resolvable:$true] %s130_s22 }
  0x25   : > { %s412_s26 = scalar_lea.hbm %s639_s23, 128  ;;  %p414_p13 = pneg %p643_p11 }
  0x26   : > { %p413_p12 = scmp.ne.s32.totalorder %s639_s23, %s412_s26  ;;  %s417_s29 = scalar_lea.hbm %s742_s1, 256 }
  0x27   : > { %p418_p3 = scmp.lt.u32.totalorder %s639_s23, %s742_s1  ;;  %p419_p7 = scmp.lt.u32.totalorder %s417_s29, %s412_s26 }
  0x28   : > { %p415_p0 = pnand %p414_p13, %p413_p12  ;;  %p421_p1 = scmp.lt.u32.totalorder %s412_s26, %s639_s23 }
  0x29   : > { %p420_p10 = por %p419_p7, %p418_p3 }
  0x2a   : > { %p416_p5 = pneg %p415_p0 }
  0x2b   : > { %p422_p2 = por %p421_p1, %p420_p10 }
  0x2d   : > { %p423_p6 = pnand %p422_p2, %p416_p5 }
  0x2f   : > { %426 = shalt.err (!%p423_p6)
}
  0x30   : > { %s427_s4 = scalar_lea.vmem %s647_s22, 128  ;;  %s515_s7 = smov [#allocation6]  }
  0x31   : > { %p428_p12 = scmp.ne.s32.totalorder %s647_s22, %s427_s4  ;;  %s432_s8 = sshll.u32 %s515_s7, 4  ;;  %s433_s8 = int_to_ptr.vmem [resolvable:$false] %s432_s8 }
  0x32   : > { %s434_s14 = scalar_lea.vmem %s433_s8, 256  ;;  %p435_p4 = scmp.lt.s32.totalorder %s647_s22, %s433_s8 }
  0x33   : > { %p430_p0 = pnand %p428_p12, %p414_p13  ;;  %p436_p3 = scmp.lt.s32.totalorder %s434_s14, %s427_s4 }
  0x35   : > { %p431_p9 = pneg %p430_p0  ;;  %p437_p7 = por %p436_p3, %p435_p4 }
  0x37   : > { %p438_p10 = pnand %p437_p7, %p431_p9 }
  0x39   : > { %441 = shalt.err (!%p438_p10)
}
  0x3a   : > { %343 = dma.hbm_to_vmem [thread:$0]  (!%p643_p11), %s639_s23, 128, %s647_s22, %s120_s25  }
  0x3b   : > { %139 = sbr.rel (%p572_p8) target bundleno = 192 (0xc0), region = 28  ;;  %p755_p6 = scmp.eq.s32.totalorder (!%p572_p8), %s553_s13, 0 }
  0x42   : > { %487 = dma.done.wait (%p755_p6), [#allocation5], 16   ;;  %p756_p13 = pmov %p755_p6 }
  0x43   : > { %s681_s19 = sand.u32 1, %s504_s10   ;;  %p757_p4 = scmp.ne.s32.totalorder %s747_s15, 0 }
  0x44   : > { %489 = vsyncadd (%p756_p13), [#allocation5], 4294967280  ;;  %s320_s21 = sshll.u32 %s681_s19, 3  ;;  %s146_s20 = scalar_lea.sflag [#allocation3], %s681_s19 }
  0x45   : > { %s149_s23 = scalar_lea.vmem [#allocation6], %s320_s21 }
  0x46   : > { %491 = dma.done.wait (%p757_p4), %s146_s20, 128  }
  0x47   : > { %493 = vsyncadd (%p757_p4), %s146_s20, 4294967168 }
  0x48   : > { %154 = sfence }
  0x49   : > { %v173_v0 = vld [vmem:[%s149_s23] sm:$0xff]  ;;  %s171_s17 = sld [smem:[#allocation2]]  ;;  %s322_s15 = sld [smem:[#allocation2 + $0x1]] }
  0x4a   : > { %v175_v1 = vand.u32 2147483647, %v173_v0  ;;  %v174_v11 = vmin.f32 %v173_v0, 0.0  ;;  %s170_s22 = scalar_lea.vmem [#allocation7], %s320_s21  ;;  %s325_s25 = sshll.u32 %s553_s13, 7 }
  0x4b   : > { %s230_s24 = sshll.u32 %s170_s22, 4  ;;  %s699_s28 = scalar_lea.hbm %s743_s2, %s325_s25  ;;  %s694_s24 = int_to_ptr.vmem [resolvable:$true] %s230_s24 }
  0x4c   : > { %v176_v2 = vsub.f32 0.0, %v175_v1  ;;  %s217_s29 = scalar_lea.sflag [#allocation4], %s681_s19  ;;  %s442_s30 = scalar_lea.vmem %s694_s24, 128 }
  0x4d   : > { %p443_p8 = scmp.ne.s32.totalorder %s694_s24, %s442_s30  ;;  %p758_p9 = scmp.ne.s32.totalorder %s753_s6, 0 }
  0x4e   : > { %v177_v3 = vmul.f32 1.442695, %v176_v2  ;;  %s516_s13 = smov [#allocation7]  }
  0x4f   : > { %v189_v14 = vstv %s171_s17  ;;  %v203_v27 = vstv %s322_s15  ;;  %p444_p11 = pnand %p443_p8, %p758_p9  ;;  %s446_s3 = sshll.u32 %s516_s13, 4  ;;  %s447_s3 = int_to_ptr.vmem [resolvable:$false] %s446_s3 }
  0x50   : > { %385 = vpow2.f32 %v177_v3  ;;  %s448_s4 = scalar_lea.vmem %s447_s3, 256  ;;  %p449_p1 = scmp.lt.s32.totalorder %s694_s24, %s447_s3 }
  0x51   : > { %p445_p5 = pneg %p444_p11  ;;  %p450_p2 = scmp.lt.s32.totalorder %s448_s4, %s442_s30 }
  0x53   : > { %p451_p12 = por %p450_p2, %p449_p1 }
  0x55   : > { %p452_p0 = pnand %p451_p12, %p445_p5 }
  0x5a   : > { %v386_v4 = vpop.eup %385 }
  0x5b   : > { %v179_v5 = vadd.f32 1.0, %v386_v4  ;;  %v182_v6 = vmul.f32 -0.5, %v386_v4  ;;  %v185_v8 = vand.u32 2147483647, %v386_v4 }
  0x5d   : > { %387 = vlog2.f32 %v179_v5  ;;  %v183_v7 = vadd.f32 1.0, %v182_v6  ;;  %vm186_vm0 = vcmp.lt.f32.partialorder %v185_v8, 0.0004427343 }
  0x5f   : > { %v184_v9 = vmul.f32 %v386_v4, %v183_v7 }
  0x67   : > { %v388_v10 = vpop.eup %387 }
  0x68   : > { %v181_v12 = vmul.f32 0.6931472, %v388_v10 }
  0x6a   : > { %v187_v13 = vsel %vm186_vm0, %v184_v9, %v181_v12 }
  0x6b   : > { %v188_v15 = vsub.f32 %v174_v11, %v187_v13 }
  0x6d   : > { %v190_v16 = vmul.f32 %v189_v14, %v188_v15 }
  0x6f   : > { %v191_v17 = vmul.f32 1.442695, %v190_v16 }
  0x71   : > { %389 = vpow2.f32 %v191_v17 }
  0x7b   : > { %v390_v18 = vpop.eup %389 }
  0x7c   : > { %v193_v19 = vsub.f32 0.0, %v390_v18 }
  0x7e   : > { %v194_v20 = vadd.f32 1.0, %v193_v19  ;;  %v197_v21 = vmul.f32 -0.5, %v193_v19  ;;  %v200_v23 = vand.u32 2147483647, %v193_v19 }
  0x80   : > { %391 = vlog2.f32 %v194_v20  ;;  %v198_v22 = vadd.f32 1.0, %v197_v21  ;;  %vm201_vm1 = vcmp.lt.f32.partialorder %v200_v23, 0.0004427343 }
  0x82   : > { %v199_v24 = vmul.f32 %v198_v22, %v193_v19 }
  0x8a   : > { %v392_v25 = vpop.eup %391 }
  0x8b   : > { %v196_v26 = vmul.f32 0.6931472, %v392_v25 }
  0x8d   : > { %v202_v28 = vsel %vm201_vm1, %v199_v24, %v196_v26 }
  0x8e   : > { %v204_v29 = vmul.f32 %v203_v27, %v202_v28 }
  0x90   : > { %v205_v30 = vmul.f32 1.442695, %v204_v29 }
  0x92   : > { %393 = vpow2.f32 %v205_v30 }
  0x9c   : > { %v394_v31 = vpop.eup %393 }
  0x9d   : > { %v207_v32 = vmul.f32 0.999998, %v394_v31 }
  0x9f   : > { %v323_v33 = vadd.f32 -1e-06, %v207_v32 }
  0xa1   : > { %v209_v34 = vsub.f32 1.0, %v323_v33  ;;  %395 = vlog2.f32 %v323_v33 }
  0xa3   : > { %397 = vlog2.f32 %v209_v34 }
  0xab   : > { %v396_v35 = vpop.eup %395 }
  0xac   : > { %v213_v36 = vmul.f32 0.6931472, %v396_v35 }
  0xad   : > { %v398_v37 = vpop.eup %397 }
  0xae   : > { %v211_v38 = vmul.f32 0.6931472, %v398_v37 }
  0xb0   : > { %v214_v39 = vsub.f32 %v211_v38, %v213_v36 }
  0xb2   : > { %215 = vst [vmem:[%s170_s22] sm:$0xff] %v214_v39 }
  0xb3   : > { %455 = shalt.err (!%p452_p0)
}
  0xb4   : > { %s456_s7 = scalar_lea.hbm %s699_s28, 128  ;;  %s460_s19 = scalar_lea.hbm %s743_s2, 256 }
  0xb5   : > { %p457_p3 = scmp.ne.s32.totalorder %s699_s28, %s456_s7  ;;  %p461_p6 = scmp.lt.u32.totalorder %s699_s28, %s743_s2 }
  0xb6   : > { %p462_p13 = scmp.lt.u32.totalorder %s460_s19, %s456_s7  ;;  %p464_p8 = scmp.lt.u32.totalorder %s456_s7, %s699_s28 }
  0xb7   : > { %p458_p7 = pnand %p457_p3, %p758_p9 }
  0xb8   : > { %p463_p4 = por %p462_p13, %p461_p6 }
  0xb9   : > { %p459_p10 = pneg %p458_p7 }
  0xba   : > { %p465_p11 = por %p464_p8, %p463_p4 }
  0xbc   : > { %p466_p5 = pnand %p465_p11, %p459_p10 }
  0xbe   : > { %469 = shalt.err (!%p466_p5)
}
  0xbf   : > { %334 = dma.vmem_to_hbm [thread:$0]  (%p758_p9), %s694_s24, 128, %s699_s28, %s217_s29  }
  0xc0 PF: > { %s242_s23 = sand.u32 1, %s500_s9   ;;  %p759_p1 = scmp.ne.s32.totalorder %s748_s16, 0 }
  0xc1   : > { %p760_p2 = scmp.ge.s32.totalorder %s512_s12, 2  ;;  %s243_s17 = scalar_lea.sflag [#allocation4], %s242_s23 }
  0xc3   : > { %p345_p12 = pnand %p760_p2, %p759_p1 }
  0xc5   : > { %495 = dma.done.wait (!%p345_p12), %s243_s17, 128  }
  0xc6   : > { %497 = vsyncadd (!%p345_p12), %s243_s17, 4294967168  ;;  %p16_p0 = scmp.ge.s32.totalorder %s578_s18, 4   ;;  %s761_s9 = smov %s504_s10 }
  0xc7   : > { %s762_s10 = smov %s508_s11  ;;  %s763_s11 = smov %s618_s5 }
  0xc8   : > { %s764_s12 = smov %s578_s18  ;;  %18 = sbr.rel (!%p16_p0) target bundleno = 6 (0x6), region = 78 }
  0xcf   :  { %248 = vsyncpa [#allocation3], 1 }
  0xd0   :  { %250 = vsyncpa [#allocation3 + $0x1], 1 }
  0xd1   :  { %251 = vsyncpa [#allocation4], 1 }
  0xd2   :  { %253 = vsyncpa [#allocation4 + $0x1], 1 }
  0xd3   :  { %254 = vsyncpa [#allocation5], 1 }
  0xd4   :  { %256 = vsyncpa [#allocation5 + $0x1], 1 }

</bundles_post_ra>
